<compile_context>
chip_gen: v6e
topology: v6e:2x2x1
jax: 0.10.0
libtpu: 0.0.40
codegen_flags: <defaults>
</compile_context>

<pallas_src>
import jax
import jax.numpy as jnp
from jax.experimental import pallas as pl
from jax.experimental.pallas import tpu as pltpu

N_STATES = 4     # CartPole observation dim
N_HIDDEN = 10
N_ACTIONS = 2    # CartPole action dim

_MAX_TILE = 4096  # max batch rows per grid step (power of two)


def _net_kernel(x_ref, w1_ref, b1_ref, w2_ref, b2_ref, out_ref):
    # Batch-major layout, everything in its natural orientation:
    #   x_ref:  (TB, N_STATES)      w1_ref: (N_STATES, N_HIDDEN)
    #   b1_ref: (1, N_HIDDEN)       w2_ref: (N_HIDDEN, N_ACTIONS)
    #   b2_ref: (1, N_ACTIONS)      out_ref:(TB, N_ACTIONS)
    x = x_ref[...]
    h = jnp.dot(x, w1_ref[...], preferred_element_type=jnp.float32)   # fc1
    h = jnp.maximum(h + b1_ref[...], 0.0)                             # ReLU
    y = jnp.dot(h, w2_ref[...], preferred_element_type=jnp.float32)   # out
    out_ref[...] = (y + b2_ref[...]).astype(out_ref.dtype)


def _bucketed_batch(B):
    # Bucket batch sizes to a small fixed set (powers of two, >= 8) so an RL
    # loop does not recompile for every distinct B.
    if B <= 8:
        return 8
    return pl.next_power_of_2(B)


def _batch_tiling(Bp):
    # Single block up to _MAX_TILE rows; above that, an even number of equal
    # _MAX_TILE tiles (Bp is a power of two, so Bp // _MAX_TILE is a power of
    # two >= 2 -> both v7x TensorCores get identical work).
    if Bp <= _MAX_TILE:
        return Bp, 1
    n = Bp // _MAX_TILE
    return _MAX_TILE, n


@jax.jit
def net_forward(x, w1t, b1_row, w2t, b2_row):
    """x: (B, N_STATES) f32 -> (B, N_ACTIONS) f32.

    w1t: (N_STATES, N_HIDDEN)  = fc1.weight.T      b1_row: (1, N_HIDDEN)
    w2t: (N_HIDDEN, N_ACTIONS) = out.weight.T      b2_row: (1, N_ACTIONS)
    (Weights pre-transposed / biases pre-shaped ONCE at init time, never per
    forward call.)
    """
    B = x.shape[0]
    Bp = _bucketed_batch(B)
    tb, nsteps = _batch_tiling(Bp)

    if Bp != B:
        # Only non-bucketed batch sizes pay for a pad + slice.  NOTE: padded
        # rows are NOT zero after the biases (relu(b1) @ w2t + b2), so never
        # reduce over the batch axis of the raw kernel output -- they are
        # sliced off below.
        x = jnp.pad(x, ((0, Bp - B), (0, 0)))

    flops = 2 * Bp * (N_STATES * N_HIDDEN + N_HIDDEN * N_ACTIONS)
    bytes_accessed = 4 * (Bp * (N_STATES + N_ACTIONS)
                          + N_STATES * N_HIDDEN + N_HIDDEN * N_ACTIONS
                          + N_HIDDEN + N_ACTIONS)

    out = pl.pallas_call(
        _net_kernel,
        out_shape=jax.ShapeDtypeStruct((Bp, N_ACTIONS), jnp.float32),
        grid=(nsteps,),
        in_specs=[
            pl.BlockSpec((tb, N_STATES), lambda i: (i, 0)),
            pl.BlockSpec((N_STATES, N_HIDDEN), lambda i: (0, 0)),
            pl.BlockSpec((1, N_HIDDEN), lambda i: (0, 0)),
            pl.BlockSpec((N_HIDDEN, N_ACTIONS), lambda i: (0, 0)),
            pl.BlockSpec((1, N_ACTIONS), lambda i: (0, 0)),
        ],
        out_specs=pl.BlockSpec((tb, N_ACTIONS), lambda i: (i, 0)),
        compiler_params=pltpu.CompilerParams(
            dimension_semantics=("parallel",)),
        cost_estimate=pl.CostEstimate(
            flops=flops, transcendentals=0, bytes_accessed=bytes_accessed),
    )(x, w1t, b1_row, w2t, b2_row)

    return out if Bp == B else out[:B]


def init_params(key):
    """Deterministic synthetic init mirroring the module's __init__.

    PyTorch: weight ~ Normal(0, 0.1) (explicit); bias ~ default
    U(-1/sqrt(fan_in), 1/sqrt(fan_in)).  Stored once in kernel-friendly
    layout: weights transposed to (in, out), biases as (1, out) rows.
    """
    k1, k2, k3, k4 = jax.random.split(key, 4)
    w1t = 0.1 * jax.random.normal(k1, (N_STATES, N_HIDDEN), jnp.float32)
    b1 = (1.0 / jnp.sqrt(N_STATES)) * jax.random.uniform(
        k2, (1, N_HIDDEN), jnp.float32, -1.0, 1.0)
    w2t = 0.1 * jax.random.normal(k3, (N_HIDDEN, N_ACTIONS), jnp.float32)
    b2 = (1.0 / jnp.sqrt(N_HIDDEN)) * jax.random.uniform(
        k4, (1, N_ACTIONS), jnp.float32, -1.0, 1.0)
    return w1t, b1, w2t, b2


def _reference(x, w1t, b1_row, w2t, b2_row):
    h = jnp.maximum(
        jnp.dot(x, w1t, precision=jax.lax.Precision.HIGHEST) + b1_row, 0.0)
    return jnp.dot(h, w2t, precision=jax.lax.Precision.HIGHEST) + b2_row


if __name__ == "__main__":
    key = jax.random.PRNGKey(0)
    kp, kx1, kx2, kx3 = jax.random.split(key, 4)
    params = init_params(kp)

    # Action-selection style batch (B=1 -> bucketed to 8, single grid step).
    x1 = jax.random.normal(kx1, (1, N_STATES), jnp.float32)
    y1 = net_forward(x1, *params)
    jax.block_until_ready(y1)
    assert y1.shape == (1, N_ACTIONS)
    assert jnp.allclose(y1, _reference(x1, *params), atol=1e-4, rtol=1e-4)

    # Typical DQN learning batch (B=32: no pad/slice, single device launch).
    x2 = jax.random.normal(kx2, (32, N_STATES), jnp.float32)
    y2 = net_forward(x2, *params)
    jax.block_until_ready(y2)
    assert y2.shape == (32, N_ACTIONS)
    assert jnp.allclose(y2, _reference(x2, *params), atol=1e-4, rtol=1e-4)

    # Large replay-buffer batch: bucketed to 8192 -> two "parallel" 4096-row
    # tiles (even split across v7x's two TensorCores; 2 cheap steps elsewhere).
    x3 = jax.random.normal(kx3, (5000, N_STATES), jnp.float32)
    y3 = net_forward(x3, *params)
    jax.block_until_ready(y3)
    assert y3.shape == (5000, N_ACTIONS)
    assert jnp.allclose(y3, _reference(x3, *params), atol=1e-4, rtol=1e-4)

    print("KERNEL_OK")
</pallas_src>

<mosaic_0001>
module attributes {stable_mosaic.version = 11 : i64} {
  func.func @_net_kernel(%arg0: i32, %arg1: memref<8x4xf32, #tpu.memory_space<vmem>>, %arg2: memref<4x10xf32, #tpu.memory_space<vmem>>, %arg3: memref<1x10xf32, #tpu.memory_space<vmem>>, %arg4: memref<10x2xf32, #tpu.memory_space<vmem>>, %arg5: memref<1x2xf32, #tpu.memory_space<vmem>>, %arg6: memref<8x2xf32, #tpu.memory_space<vmem>>) attributes {dimension_semantics = [#tpu.dimension_semantics<parallel>], iteration_bounds = array<i64: 1>, scalar_prefetch = 0 : i64, scratch_operands = 0 : i64, tpu.core_type = #tpu.core_type<tc>, window_params = [{transform_indices = @transform_0, window_bounds = array<i64: 8, 4>}, {pipeline_mode = #tpu.pipeline_mode<synchronous>, transform_indices = @transform_1, window_bounds = array<i64: 4, 10>}, {pipeline_mode = #tpu.pipeline_mode<synchronous>, transform_indices = @transform_2, window_bounds = array<i64: 1, 10>}, {pipeline_mode = #tpu.pipeline_mode<synchronous>, transform_indices = @transform_3, window_bounds = array<i64: 10, 2>}, {pipeline_mode = #tpu.pipeline_mode<synchronous>, transform_indices = @transform_4, window_bounds = array<i64: 1, 2>}, {transform_indices = @transform_5, window_bounds = array<i64: 8, 2>}]} {
    %c0 = arith.constant 0 : index
    %c0_0 = arith.constant 0 : index
    %0 = vector.load %arg1[%c0, %c0_0] : memref<8x4xf32, #tpu.memory_space<vmem>>, vector<8x4xf32>
    %c0_1 = arith.constant 0 : index
    %c0_2 = arith.constant 0 : index
    %1 = vector.load %arg2[%c0_1, %c0_2] : memref<4x10xf32, #tpu.memory_space<vmem>>, vector<4x10xf32>
    %cst = arith.constant dense<0.000000e+00> : vector<8x10xf32>
    %2 = tpu.matmul %0, %1, %cst {dimension_numbers = #tpu.dot_dimension_numbers<[1], [0], [0], [1], [0, 0, 1, 1], [], []>} : vector<8x4xf32>, vector<4x10xf32>, vector<8x10xf32> -> vector<8x10xf32>
    %c0_3 = arith.constant 0 : index
    %c0_4 = arith.constant 0 : index
    %3 = vector.load %arg3[%c0_3, %c0_4] : memref<1x10xf32, #tpu.memory_space<vmem>>, vector<1x10xf32>
    %4 = vector.broadcast %3 : vector<1x10xf32> to vector<8x10xf32>
    %5 = arith.addf %2, %4 : vector<8x10xf32>
    %cst_5 = arith.constant 0.000000e+00 : f32
    %6 = vector.broadcast %cst_5 : f32 to vector<8x10xf32>
    %7 = arith.maximumf %5, %6 : vector<8x10xf32>
    %c0_6 = arith.constant 0 : index
    %c0_7 = arith.constant 0 : index
    %8 = vector.load %arg4[%c0_6, %c0_7] : memref<10x2xf32, #tpu.memory_space<vmem>>, vector<10x2xf32>
    %cst_8 = arith.constant dense<0.000000e+00> : vector<8x2xf32>
    %9 = tpu.matmul %7, %8, %cst_8 {dimension_numbers = #tpu.dot_dimension_numbers<[1], [0], [0], [1], [0, 0, 1, 1], [], []>} : vector<8x10xf32>, vector<10x2xf32>, vector<8x2xf32> -> vector<8x2xf32>
    %c0_9 = arith.constant 0 : index
    %c0_10 = arith.constant 0 : index
    %10 = vector.load %arg5[%c0_9, %c0_10] : memref<1x2xf32, #tpu.memory_space<vmem>>, vector<1x2xf32>
    %11 = vector.broadcast %10 : vector<1x2xf32> to vector<8x2xf32>
    %12 = arith.addf %9, %11 : vector<8x2xf32>
    %c0_11 = arith.constant 0 : index
    %c0_12 = arith.constant 0 : index
    %13 = vector.load %arg6[%c0_11, %c0_12] : memref<8x2xf32, #tpu.memory_space<vmem>>, vector<8x2xf32>
    tpu.vector_store %arg6[%c0_11, %c0_12], %12 {strides = array<i32>} : memref<8x2xf32, #tpu.memory_space<vmem>>, vector<8x2xf32>,
    return
  }
  func.func @transform_0(%arg0: i32) -> (i32, i32) {
    %c0_i32 = arith.constant 0 : i32
    %c0_i32_0 = arith.constant 0 : i32
    return %arg0, %c0_i32 : i32, i32
  }
  func.func @transform_1(%arg0: i32) -> (i32, i32) {
    %c0_i32 = arith.constant 0 : i32
    %c0_i32_0 = arith.constant 0 : i32
    %c0_i32_1 = arith.constant 0 : i32
    return %c0_i32, %c0_i32_0 : i32, i32
  }
  func.func @transform_2(%arg0: i32) -> (i32, i32) {
    %c0_i32 = arith.constant 0 : i32
    %c0_i32_0 = arith.constant 0 : i32
    %c0_i32_1 = arith.constant 0 : i32
    return %c0_i32, %c0_i32_0 : i32, i32
  }
  func.func @transform_3(%arg0: i32) -> (i32, i32) {
    %c0_i32 = arith.constant 0 : i32
    %c0_i32_0 = arith.constant 0 : i32
    %c0_i32_1 = arith.constant 0 : i32
    return %c0_i32, %c0_i32_0 : i32, i32
  }
  func.func @transform_4(%arg0: i32) -> (i32, i32) {
    %c0_i32 = arith.constant 0 : i32
    %c0_i32_0 = arith.constant 0 : i32
    %c0_i32_1 = arith.constant 0 : i32
    return %c0_i32, %c0_i32_0 : i32, i32
  }
  func.func @transform_5(%arg0: i32) -> (i32, i32) {
    %c0_i32 = arith.constant 0 : i32
    %c0_i32_0 = arith.constant 0 : i32
    return %arg0, %c0_i32 : i32, i32
  }
}

</mosaic_0001>

<bundles_post_ra>
// kernel: net_forward.1
= control target key start
LH: loop header
LB: loop body
LE: loop exit
PB: predicated region body
PF: predicated region fallthrough
CT: control target
= control target key end

     0   :  { %vm33_vm0 = vcmask 1043456   ;;  %vm29_vm1 = vcmask 31744   ;;  %v226_v0 = vmov 0.0   ;;  %vm227_vm2 = vmmov 0   ;;  %s279_s1 = inlined_call_operand.vmem [shape: f32[4,10], index: 1, kind: input, shape index: {}]   ;;  %s280_s0 = inlined_call_operand.vmem [shape: f32[8,4], index: 0, kind: input, shape index: {}]   ;;  %s281_s3 = inlined_call_operand.vmem [shape: f32[10,2], index: 3, kind: input, shape index: {}]   ;;  %s282_s2 = inlined_call_operand.vmem [shape: f32[1,10], index: 2, kind: input, shape index: {}]   ;;  %s283_s4 = inlined_call_operand.vmem [shape: f32[1,2], index: 4, kind: input, shape index: {}]   ;;  %s284_s5 = inlined_call_operand.vmem [shape: f32[8,2], index: 5, kind: output, shape index: {}]  }
   0x1   :  { %212 = vmatprep.subr.mxu0 %v226_v0  ;;  %v21_v1 = vld [vmem:[%s279_s1] sm:$0xf]  ;;  %214 = vmatprep.mubr.msk.f32.mxu0 %vm227_vm2, %v226_v0  ;;  %v109_v3 = vld [vmem:[%s281_s3 + $0x8] sm:$0x3]  ;;  %vm121_vm3 = vcmask 1041408   ;;  %vm117_vm4 = vcmask 80896  }
   0x2   :  { %v20_v2 = vld [vmem:[%s280_s0] sm:$0xff]  ;;  %213 = vmatpush3.msk.msra.mxu0 %vm33_vm0, %v21_v1  ;;  %217 = vmatprep.subr.mxu1 %v226_v0  ;;  %vm195_vm5 = vcmask 15360  }
   0x3   :  { %215 = vmatmul.mubr.msk.f32.vlgmr.msra.gmra.mxu0 %vm29_vm1, %v20_v2  ;;  %221 = vmatprep.mubr.msk.f32.mxu1 %vm227_vm2, %v226_v0  ;;  %v108_v4 = vld [vmem:[%s281_s3] sm:$0xff] }
   0x4   :  { %218 = vmatpush3.msk.msra.mxu1 %vm121_vm3, %v109_v3  ;;  %v201_v5 = vld [vmem:[%s282_s2] ss:$0 sm:$0xff] }
   0x5   :  { %219 = vmatprep.subr.mxu1 %v226_v0  ;;  %v204_v10 = vld [vmem:[%s283_s4] ss:$0 sm:$0xff] }
   0x6   :  { %220 = vmatpush3.msra.mxu1 %v108_v4 }
  0xc3   :  { %v103_v6 = vpop.f32.mrf.mxu0 }
  0xc4   :  { %v104_v7 = vadd.f32 %v201_v5, %v103_v6 }
  0xc5   :  { %v216_v8 = vpop.f32.mrf.mxu0 }
  0xc6   :  { %v107_v9 = vmax.f32 %v104_v7, 0.0 }
  0xc8   :  { %222 = vmatmul.mubr.msk.f32.vlgmr.msra.gmra.mxu1 %vm117_vm4, %v107_v9 }
 0x188   :  { %v191_v11 = vpop.f32.mrf.mxu1 }
 0x189   :  { %v192_v12 = vadd.f32 %v204_v10, %v191_v11 }
 0x18a   :  { %v223_v13 = vpop.f32.mrf.mxu1 }
 0x18b   :  { %196 = vst.msk [vmem:[%s284_s5] sm:$0xff] %vm195_vm5, %v192_v12 }

</bundles_post_ra>
